<compile_context>
chip_gen: v7x
topology: tpu7x:2x2x1
jax: 0.10.0
libtpu: 0.0.40
codegen_flags: <defaults>
</compile_context>

<pallas_src>
import functools

import jax
import jax.numpy as jnp
from jax.experimental import pallas as pl
from jax.experimental.pallas import tpu as pltpu

EPS = 1e-5  # nn.LayerNorm default

_MAX_BLOCK_ROWS = 8192               # sanity cap on sublane extent for very small D
_SMALL_INPUT_BYTES = 1 * 1024 * 1024  # below this f32 working set: single grid step
_MIN_STEPS = 4                        # >= 4 even steps balances v7x's 2 TCs & fills pipeline


def _layernorm_kernel(x_ref, w_ref, b_ref, o_ref, *, eps):
    # x_ref: (block_rows, D) tile; normalize each row over the last dim (f32 accumulation).
    # Single-pass reduction (sum & sum-of-squares) -> removes the `centered` temp and one
    # full pass over the f32 block; gamma folded into the normalization scale.
    x = x_ref[...].astype(jnp.float32)
    mean = jnp.mean(x, axis=-1, keepdims=True)
    var = jnp.mean(x * x, axis=-1, keepdims=True) - mean * mean
    var = jnp.maximum(var, 0.0)  # guard tiny negative from cancellation
    scale = jax.lax.rsqrt(var + eps) * w_ref[...]  # (rows, d): gamma folded into the scale
    o_ref[...] = ((x - mean) * scale + b_ref[...]).astype(o_ref.dtype)


def _sublane_multiple(dtype):
    # Sub-32-bit dtypes pack along sublanes: 8 for f32, 16 for bf16, 32 for int8/fp8.
    return max(8, 32 // max(1, jnp.dtype(dtype).itemsize))


def _vmem_budget():
    """Per-generation (vmem_limit_bytes, target f32 block bytes)."""
    try:
        phys = getattr(pltpu.get_tpu_info(), "vmem_capacity_bytes", None)
    except Exception:
        phys = None
    if phys is not None and phys >= 96 * 1024 * 1024:
        # v5e / v6e: 128 MiB physical VMEM -> generous scoped limit, bigger tiles.
        return 48 * 1024 * 1024, 4 * 1024 * 1024
    # v7x (64 MiB physical) or unknown generation: conservative; >= 16 MiB headroom left.
    return 32 * 1024 * 1024, 2 * 1024 * 1024


def _choose_block_rows(n_rows, d, dtype, target_block_bytes):
    """Row-block choice:
      * size by the f32 working set (kernel upcasts the block to f32),
      * tiny inputs -> one grid step,
      * large inputs -> >= 4 evenly sized steps (even count) so v7x's 2 TensorCores balance,
      * round to the packed sublane multiple of the input dtype."""
    sub = _sublane_multiple(dtype)
    f32_total = n_rows * d * 4
    if f32_total <= _SMALL_INPUT_BYTES or n_rows <= sub:
        return n_rows
    steps = pl.cdiv(f32_total, target_block_bytes)
    steps = max(_MIN_STEPS, steps)
    steps += steps % 2                       # even step count
    block = pl.cdiv(n_rows, steps)
    block = -(-block // sub) * sub           # round up to packed sublane multiple
    block = min(block, _MAX_BLOCK_ROWS)
    if block >= n_rows:
        return n_rows
    return block


def pallas_layernorm(x, weight, bias, *, eps=EPS):
    """LayerNorm over the last dim of x (any leading dims), computed in a Pallas kernel."""
    orig_shape = x.shape
    d = orig_shape[-1]
    n_rows = x.size // d
    x2 = x.reshape(n_rows, d)  # collapse leading dims only: minor dim unchanged, no copy

    w2 = weight.astype(jnp.float32).reshape(1, d)
    b2 = bias.astype(jnp.float32).reshape(1, d)

    vmem_limit, target_block_bytes = _vmem_budget()
    block_rows = _choose_block_rows(n_rows, d, x.dtype, target_block_bytes)
    grid = (pl.cdiv(n_rows, block_rows),)  # ragged final block masked by Pallas (no pad/slice)

    out = pl.pallas_call(
        functools.partial(_layernorm_kernel, eps=eps),
        out_shape=jax.ShapeDtypeStruct((n_rows, d), x.dtype),
        grid_spec=pltpu.PrefetchScalarGridSpec(
            num_scalar_prefetch=0,
            grid=grid,
            in_specs=[
                pl.BlockSpec((block_rows, d), lambda i: (i, 0)),
                pl.BlockSpec((1, d), lambda i: (0, 0)),  # gamma: constant block, stays resident
                pl.BlockSpec((1, d), lambda i: (0, 0)),  # beta
            ],
            out_specs=pl.BlockSpec((block_rows, d), lambda i: (i, 0)),
        ),
        compiler_params=pltpu.CompilerParams(
            dimension_semantics=("parallel",),
            vmem_limit_bytes=vmem_limit,
        ),
    )(x2, w2, b2)

    return out.reshape(orig_shape)


class PreNormPallas:
    """JAX/Pallas equivalent of the PyTorch PreNorm module."""

    def __init__(self, dim, fn, context_dim=None):
        self.fn = fn
        # nn.LayerNorm default init: weight = 1, bias = 0 (deterministic).
        self.norm_w = jnp.ones((dim,), jnp.float32)
        self.norm_b = jnp.zeros((dim,), jnp.float32)
        if context_dim is not None:
            self.ctx_w = jnp.ones((context_dim,), jnp.float32)
            self.ctx_b = jnp.zeros((context_dim,), jnp.float32)
        else:
            self.ctx_w = None
            self.ctx_b = None

    def __call__(self, x, **kwargs):
        x = pallas_layernorm(x, self.norm_w, self.norm_b)
        if self.ctx_w is not None:
            context = kwargs["context"]
            normed_context = pallas_layernorm(context, self.ctx_w, self.ctx_b)
            kwargs = dict(kwargs, context=normed_context)
        return self.fn(x, **kwargs)


if __name__ == "__main__":
    # Small shapes consistent with the module's forward: x (B, N, D), context (B, M, C).
    B, N, D = 2, 9, 32
    M, C = 8, 16

    key = jax.random.PRNGKey(0)
    kx, kc, kw, kb = jax.random.split(key, 4)
    x = jax.random.normal(kx, (B, N, D), dtype=jnp.float32)
    context = jax.random.normal(kc, (B, M, C), dtype=jnp.float32)

    # `fn` is an arbitrary user-supplied module in the original code; here a small
    # deterministic JAX callable that consumes both the normed x and normed context.
    W_ctx = jax.random.normal(kw, (C, D), dtype=jnp.float32) * 0.02

    def fn(x, context=None):
        ctx_pooled = jnp.mean(context, axis=1, keepdims=True)  # (B, 1, C)
        return x + ctx_pooled @ W_ctx                            # (B, N, D)

    module = PreNormPallas(dim=D, fn=fn, context_dim=C)
    out = jax.block_until_ready(module(x, context=context))

    # Pure-JAX LayerNorm reference.
    def ref_ln(v, w, b):
        mu = jnp.mean(v, axis=-1, keepdims=True)
        var = jnp.mean((v - mu) ** 2, axis=-1, keepdims=True)
        return (v - mu) * jax.lax.rsqrt(var + EPS) * w + b

    ref = fn(ref_ln(x, module.norm_w, module.norm_b),
             context=ref_ln(context, module.ctx_w, module.ctx_b))
    assert jnp.allclose(out, ref, atol=1e-5, rtol=1e-5), "mismatch vs reference (small shapes)"

    # Second check: exercises the multi-step grid (>= 4 even steps), bf16 packed-sublane
    # rounding, lane-dense (D=128) stores, and a ragged final block.
    xb = jax.random.normal(kb, (1, 4000, 128), dtype=jnp.float32).astype(jnp.bfloat16)
    big = PreNormPallas(dim=128, fn=lambda v: v)
    out_b = jax.block_until_ready(big(xb))
    ref_b = ref_ln(xb.astype(jnp.float32), big.norm_w, big.norm_b)
    assert jnp.allclose(out_b.astype(jnp.float32), ref_b, atol=3e-2, rtol=3e-2), \
        "mismatch vs reference (bf16 multi-step)"

    print("KERNEL_OK")
</pallas_src>

<mosaic_0001>
module attributes {stable_mosaic.version = 11 : i64} {
  func.func @_layernorm_kernel(%arg0: i32, %arg1: memref<18x32xf32, #tpu.memory_space<vmem>>, %arg2: memref<1x32xf32, #tpu.memory_space<vmem>>, %arg3: memref<1x32xf32, #tpu.memory_space<vmem>>, %arg4: memref<18x32xf32, #tpu.memory_space<vmem>>) attributes {dimension_semantics = [#tpu.dimension_semantics<parallel>], iteration_bounds = array<i64: 1>, scalar_prefetch = 0 : i64, scratch_operands = 0 : i64, tpu.core_type = #tpu.core_type<tc>, window_params = [{transform_indices = @transform_0, window_bounds = array<i64: 18, 32>}, {pipeline_mode = #tpu.pipeline_mode<synchronous>, transform_indices = @transform_1, window_bounds = array<i64: 1, 32>}, {pipeline_mode = #tpu.pipeline_mode<synchronous>, transform_indices = @transform_2, window_bounds = array<i64: 1, 32>}, {transform_indices = @transform_3, window_bounds = array<i64: 18, 32>}]} {
    %c0 = arith.constant 0 : index
    %c0_0 = arith.constant 0 : index
    %0 = vector.load %arg1[%c0, %c0_0] : memref<18x32xf32, #tpu.memory_space<vmem>>, vector<18x32xf32>
    %cst = arith.constant dense<0.000000e+00> : vector<18xf32>
    %1 = vector.multi_reduction <add>, %0, %cst [1] : vector<18x32xf32> to vector<18xf32>
    %2 = vector.shape_cast %1 : vector<18xf32> to vector<18x1xf32>
    %cst_1 = arith.constant 3.200000e+01 : f32
    %3 = vector.broadcast %cst_1 : f32 to vector<18x1xf32>
    %4 = arith.divf %2, %3 : vector<18x1xf32>
    %5 = arith.mulf %0, %0 : vector<18x32xf32>
    %cst_2 = arith.constant dense<0.000000e+00> : vector<18xf32>
    %6 = vector.multi_reduction <add>, %5, %cst_2 [1] : vector<18x32xf32> to vector<18xf32>
    %7 = vector.shape_cast %6 : vector<18xf32> to vector<18x1xf32>
    %cst_3 = arith.constant 3.200000e+01 : f32
    %8 = vector.broadcast %cst_3 : f32 to vector<18x1xf32>
    %9 = arith.divf %7, %8 : vector<18x1xf32>
    %10 = arith.mulf %4, %4 : vector<18x1xf32>
    %11 = arith.subf %9, %10 : vector<18x1xf32>
    %cst_4 = arith.constant 0.000000e+00 : f32
    %12 = vector.broadcast %cst_4 : f32 to vector<18x1xf32>
    %13 = arith.maximumf %11, %12 : vector<18x1xf32>
    %cst_5 = arith.constant 9.99999974E-6 : f32
    %14 = vector.broadcast %cst_5 : f32 to vector<18x1xf32>
    %15 = arith.addf %13, %14 : vector<18x1xf32>
    %16 = math.rsqrt %15 : vector<18x1xf32>
    %c0_6 = arith.constant 0 : index
    %c0_7 = arith.constant 0 : index
    %17 = vector.load %arg2[%c0_6, %c0_7] : memref<1x32xf32, #tpu.memory_space<vmem>>, vector<1x32xf32>
    %18 = vector.broadcast %16 : vector<18x1xf32> to vector<18x32xf32>
    %19 = vector.broadcast %17 : vector<1x32xf32> to vector<18x32xf32>
    %20 = arith.mulf %18, %19 : vector<18x32xf32>
    %21 = vector.broadcast %4 : vector<18x1xf32> to vector<18x32xf32>
    %22 = arith.subf %0, %21 : vector<18x32xf32>
    %23 = arith.mulf %22, %20 : vector<18x32xf32>
    %c0_8 = arith.constant 0 : index
    %c0_9 = arith.constant 0 : index
    %24 = vector.load %arg3[%c0_8, %c0_9] : memref<1x32xf32, #tpu.memory_space<vmem>>, vector<1x32xf32>
    %25 = vector.broadcast %24 : vector<1x32xf32> to vector<18x32xf32>
    %26 = arith.addf %23, %25 : vector<18x32xf32>
    %c0_10 = arith.constant 0 : index
    %c0_11 = arith.constant 0 : index
    %27 = vector.load %arg4[%c0_10, %c0_11] : memref<18x32xf32, #tpu.memory_space<vmem>>, vector<18x32xf32>
    tpu.vector_store %arg4[%c0_10, %c0_11], %26 {strides = array<i32>} : memref<18x32xf32, #tpu.memory_space<vmem>>, vector<18x32xf32>,
    return
  }
  func.func @transform_0(%arg0: i32) -> (i32, i32) {
    %c0_i32 = arith.constant 0 : i32
    %c0_i32_0 = arith.constant 0 : i32
    return %arg0, %c0_i32 : i32, i32
  }
  func.func @transform_1(%arg0: i32) -> (i32, i32) {
    %c0_i32 = arith.constant 0 : i32
    %c0_i32_0 = arith.constant 0 : i32
    %c0_i32_1 = arith.constant 0 : i32
    return %c0_i32, %c0_i32_0 : i32, i32
  }
  func.func @transform_2(%arg0: i32) -> (i32, i32) {
    %c0_i32 = arith.constant 0 : i32
    %c0_i32_0 = arith.constant 0 : i32
    %c0_i32_1 = arith.constant 0 : i32
    return %c0_i32, %c0_i32_0 : i32, i32
  }
  func.func @transform_3(%arg0: i32) -> (i32, i32) {
    %c0_i32 = arith.constant 0 : i32
    %c0_i32_0 = arith.constant 0 : i32
    return %arg0, %c0_i32 : i32, i32
  }
}

</mosaic_0001>

<bundles_post_ra>
// kernel: tpu_custom_call.1
= control target key start
LH: loop header
LB: loop body
LE: loop exit
PB: predicated region body
PF: predicated region fallthrough
CT: control target
= control target key end

     0   :  { %8 = vsyncpa [#allocation3], 0  ;;  %s252_s0 = inlined_call_operand.hbm [shape: f32[18,32], index: 0, kind: input, shape index: {}]   ;;  %s253_s1 = inlined_call_operand.vmem [shape: f32[1,32], index: 1, kind: input, shape index: {}]   ;;  %s254_s2 = inlined_call_operand.vmem [shape: f32[1,32], index: 2, kind: input, shape index: {}]   ;;  %s255_s3 = inlined_call_operand.hbm [shape: f32[18,32], index: 3, kind: output, shape index: {}]  }
   0x1   :  { %9 = vsyncpa [#allocation4], 0  ;;  %s183_s12 = smov [#allocation2]   ;;  %s135_s16 = scalar_lea.hbm %s252_s0, 384 }
   0x2   :  { %s15_s13 = sshll.u32 %s183_s12, 4  ;;  %p136_p0 = scmp.ne.s32.totalorder %s252_s0, %s135_s16  ;;  %s16_s13 = int_to_ptr.vmem [resolvable:$true] %s15_s13 }
   0x3   :  { %p139_p1 = scmp.lt.u32.totalorder %s135_s16, %s252_s0 }
   0x5   :  { %p141_p2 = pnand %p139_p1, %p136_p0 }
   0x7   :  { %144 = shalt.err (!%p141_p2)
}
   0x8   :  { %s145_s21 = scalar_lea.vmem %s16_s13, 384  ;;  %p150_p4 = scmp.lt.s32.totalorder %s16_s13, %s16_s13 }
   0x9   :  { %p146_p3 = scmp.ne.s32.totalorder %s16_s13, %s145_s21  ;;  %p151_p5 = scmp.lt.s32.totalorder %s145_s21, %s145_s21 }
   0xb   :  { %p152_p6 = por %p151_p5, %p150_p4 }
   0xd   :  { %p153_p7 = pnand %p152_p6, %p146_p3 }
   0xf   :  { %156 = shalt.err (!%p153_p7)
}
  0x10   :  { %s184_s22 = smov 128   ;;  %s185_s23 = smov 8  }
  0x11   :  { %21 = dma.hbm_to_vmem [thread:$0]  %s252_s0, 384, %s16_s13, [#allocation3], %s184_s22, %s184_s22, %s185_s23  }
  0x12   :  { %179 = dma.done.wait [#allocation3], 384  }
  0x13   :  { %180 = vsyncadd [#allocation3], 4294966912  ;;  %vm39_vm0 = vcmask 254976   ;;  %vm32_vm1 = vcmask 261120   ;;  %v31_v0 = vld [vmem:[#allocation2 + $0x10] sm:$0x3] }
  0x14   :  { %v29_v1 = vld [vmem:[#allocation2] sm:$0xff]  ;;  %v30_v2 = vld [vmem:[#allocation2 + $0x8] sm:$0xff]  ;;  %v40_v3 = vsel %vm39_vm0, %v31_v0, 0.0  ;;  %v49_v8 = vmul.f32 %v31_v0, %v31_v0  ;;  %s186_s29 = smov [#allocation5]  }
  0x15   :  { %v33_v4 = vsel %vm32_vm1, %v29_v1, 0.0  ;;  %v47_v5 = vmul.f32 %v29_v1, %v29_v1  ;;  %41 = vadd.xlane.f32.xlu1 %v40_v3  ;;  %v36_v7 = vsel %vm32_vm1, %v30_v2, 0.0  ;;  %v48_v9 = vmul.f32 %v30_v2, %v30_v2  ;;  %v123_v36 = vld [vmem:[%s253_s1] ss:$0 sm:$0xff]  ;;  %s111_s1 = sshll.u32 %s186_s29, 4  ;;  %s112_s1 = int_to_ptr.vmem [resolvable:$true] %s111_s1 }
  0x16   :  { %34 = vadd.xlane.f32.xlu0 %v33_v4  ;;  %v56_v10 = vsel %vm39_vm0, %v49_v8, 0.0  ;;  %v124_v40 = vld [vmem:[%s254_s2] ss:$0 sm:$0xff]  ;;  %s157_s2 = scalar_lea.vmem %s112_s1, 384  ;;  %p162_p9 = scmp.lt.s32.totalorder %s112_s1, %s112_s1 }
  0x17   :  { %v50_v6 = vsel %vm32_vm1, %v47_v5, 0.0  ;;  %v53_v11 = vsel %vm32_vm1, %v48_v9, 0.0  ;;  %p158_p8 = scmp.ne.s32.totalorder %s112_s1, %s157_s2  ;;  %p163_p10 = scmp.lt.s32.totalorder %s157_s2, %s157_s2 }
  0x19   :  { %51 = vadd.xlane.f32.xlu1 %v50_v6  ;;  %p164_p11 = por %p163_p10, %p162_p9 }
  0x1a   :  { %37 = vadd.xlane.f32.xlu0 %v36_v7 }
  0x1b   :  { %p165_p12 = pnand %p164_p11, %p158_p8 }
  0x1d   :  { %57 = vadd.xlane.f32.xlu1 %v56_v10 }
  0x1e   :  { %54 = vadd.xlane.f32.xlu0 %v53_v11 }
  0xa2   :  { %v42_v12 = vpop.xlane.xlu1 %41 }
  0xa3   :  { %v35_v13 = vpop.xlane.xlu0 %34  ;;  %v46_v15 = vmul.f32 0.03125, %v42_v12 }
  0xa4   :  { %v44_v14 = vmul.f32 0.03125, %v35_v13 }
  0xa5   :  { %v64_v22 = vmul.f32 %v46_v15, %v46_v15  ;;  %v89_v44 = vsub.f32 %v31_v0, %v46_v15 }
  0xa6   :  { %v52_v16 = vpop.xlane.xlu1 %51  ;;  %v62_v18 = vmul.f32 %v44_v14, %v44_v14  ;;  %v87_v38 = vsub.f32 %v29_v1, %v44_v14 }
  0xa7   :  { %v38_v17 = vpop.xlane.xlu0 %37  ;;  %v59_v19 = vmul.f32 0.03125, %v52_v16 }
  0xa8   :  { %v45_v20 = vmul.f32 0.03125, %v38_v17 }
  0xa9   :  { %v65_v21 = vsub.f32 %v59_v19, %v62_v18 }
  0xaa   :  { %v58_v23 = vpop.xlane.xlu1 %57  ;;  %v63_v26 = vmul.f32 %v45_v20, %v45_v20  ;;  %v88_v47 = vsub.f32 %v30_v2, %v45_v20 }
  0xab   :  { %v55_v24 = vpop.xlane.xlu0 %54  ;;  %v68_v25 = vmax.f32 %v65_v21, 0.0  ;;  %v61_v27 = vmul.f32 0.03125, %v58_v23 }
  0xac   :  { %v60_v28 = vmul.f32 0.03125, %v55_v24 }
  0xad   :  { %v71_v29 = vadd.f32 1e-05, %v68_v25  ;;  %v67_v30 = vsub.f32 %v61_v27, %v64_v22 }
  0xae   :  { %v66_v31 = vsub.f32 %v60_v28, %v63_v26 }
  0xaf   :  { %129 = vrsqrt.f32 %v71_v29  ;;  %v70_v32 = vmax.f32 %v67_v30, 0.0 }
  0xb0   :  { %v69_v33 = vmax.f32 %v66_v31, 0.0 }
  0xb1   :  { %v73_v34 = vadd.f32 1e-05, %v70_v32 }
  0xb2   :  { %v72_v35 = vadd.f32 1e-05, %v69_v33 }
  0xb3   :  { %131 = vrsqrt.f32 %v73_v34 }
  0xb4   :  { %133 = vrsqrt.f32 %v72_v35 }
  0xb9   :  { %v130_v37 = vpop.eup %129 }
  0xba   :  { %v84_v39 = vmul.f32 %v130_v37, %v123_v36 }
  0xbc   :  { %v90_v41 = vmul.f32 %v87_v38, %v84_v39 }
  0xbd   :  { %v132_v42 = vpop.eup %131 }
  0xbe   :  { %v134_v43 = vpop.eup %133  ;;  %v86_v45 = vmul.f32 %v132_v42, %v123_v36  ;;  %v100_v46 = vadd.f32 %v124_v40, %v90_v41 }
  0xbf   :  { %v85_v48 = vmul.f32 %v134_v43, %v123_v36 }
  0xc0   :  { %v92_v49 = vmul.f32 %v89_v44, %v86_v45  ;;  %103 = vst.msk [vmem:[#allocation5] sm:$0xff] %vm32_vm1, %v100_v46 }
  0xc1   :  { %v91_v50 = vmul.f32 %v88_v47, %v85_v48 }
  0xc2   :  { %v102_v51 = vadd.f32 %v124_v40, %v92_v49 }
  0xc3   :  { %v101_v52 = vadd.f32 %v124_v40, %v91_v50 }
  0xc4   :  { %105 = vst.msk [vmem:[#allocation5 + $0x10] sm:$0x3] %vm39_vm0, %v102_v51 }
  0xc5   :  { %104 = vst.msk [vmem:[#allocation5 + $0x8] sm:$0xff] %vm32_vm1, %v101_v52 }
  0xc6   :  { %168 = shalt.err (!%p165_p12)
}
  0xc7   :  { %s169_s5 = scalar_lea.hbm %s255_s3, 384 }
  0xc8   :  { %p170_p13 = scmp.ne.s32.totalorder %s255_s3, %s169_s5  ;;  %p173_p0 = scmp.lt.u32.totalorder %s169_s5, %s255_s3 }
  0xca   :  { %p175_p1 = pnand %p173_p0, %p170_p13 }
  0xcc   :  { %178 = shalt.err (!%p175_p1)
}
  0xcd   :  { %117 = dma.vmem_to_hbm [thread:$0]  %s112_s1, 384, %s255_s3, [#allocation4], %s184_s22, %s184_s22, %s185_s23  }
  0xce   :  { %181 = dma.done.wait [#allocation4], 384  }
  0xcf   :  { %182 = vsyncadd [#allocation4], 4294966912 }
  0xd0   :  { %121 = vsyncpa [#allocation3], 1 }
  0xd1   :  { %122 = vsyncpa [#allocation4], 1 }

</bundles_post_ra>
